<compile_context>
chip_gen: v7x
topology: tpu7x:2x2x1
jax: 0.10.0
libtpu: 0.0.40
codegen_flags: <defaults>
</compile_context>

<pallas_src>
import functools

import jax
import jax.numpy as jnp
from jax.experimental import pallas as pl
from jax.experimental.pallas import tpu as pltpu


# Rows packed into one MXU super-block. 128 is full-height/lane-dense on every
# generation; bump to 256 on v6e/v7x (2x256x256 MXU) for large batches.
_GN_TARGET = 128


# ----------------------------------------------------------------------------
# Pallas kernel: one super-step = G graphs packed block-diagonally.
#   adj_ref : (GN, GN)  bf16   block-diagonal normalized adjacency (G graphs)
#   h0_ref  : (GN, Hp)  bf16   (x @ We + be) @ W1   (embedding fused into gcn1)
#   b1..b3  : (1, Hp)   bf16   biases, lane padded
#   w2, w3  : (Hp, Hp)  bf16   weights, zero-padded rows/cols
#   out_ref : (GN, Hp)  bf16
# Every dot is MXU-shaped and accumulates in f32.
# ----------------------------------------------------------------------------
def gcn1_kernel(adj_ref, h0_ref, b1_ref, w2_ref, b2_ref, w3_ref, b3_ref, out_ref):
    adj = adj_ref[...]

    # gcn1: relu(adj @ h0 + b1)   (h0 already carries the embedding and W1)
    h = jnp.dot(adj, h0_ref[...], preferred_element_type=jnp.float32)
    h = jnp.maximum(h + b1_ref[...].astype(jnp.float32), 0.0).astype(jnp.bfloat16)

    # gcn2: relu((adj @ h) @ W2 + b2)
    h = jnp.dot(adj, h, preferred_element_type=jnp.float32).astype(jnp.bfloat16)
    h = jnp.dot(h, w2_ref[...], preferred_element_type=jnp.float32)
    h = jnp.maximum(h + b2_ref[...].astype(jnp.float32), 0.0).astype(jnp.bfloat16)

    # gcn3: (adj @ h) @ W3 + b3   (no activation, matches the PyTorch forward)
    h = jnp.dot(adj, h, preferred_element_type=jnp.float32).astype(jnp.bfloat16)
    h = jnp.dot(h, w3_ref[...], preferred_element_type=jnp.float32)
    h = h + b3_ref[...].astype(jnp.float32)

    out_ref[...] = h.astype(out_ref.dtype)


def gcn1_pallas(adj_s, h0_s, fp):
    """adj_s: (S, GN, GN) bf16, h0_s: (S, GN, Hp) bf16 -> (S, GN, Hp) bf16."""
    S, GN, _ = adj_s.shape
    Hp = h0_s.shape[-1]

    def per_step(shape2d):
        return pl.BlockSpec((None,) + tuple(shape2d), lambda s: (s, 0, 0))

    def shared(arr):
        # Grid-invariant weights/biases: full-array blocks, same index every step.
        return pl.BlockSpec(arr.shape, lambda s: (0,) * arr.ndim)

    grid_spec = pltpu.PrefetchScalarGridSpec(
        num_scalar_prefetch=0,
        grid=(S,),
        in_specs=[
            per_step((GN, GN)),          # adj (block-diagonal)
            per_step((GN, Hp)),          # h0
            shared(fp["b1"]), shared(fp["w2"]), shared(fp["b2"]),
            shared(fp["w3"]), shared(fp["b3"]),
        ],
        out_specs=per_step((GN, Hp)),
    )

    return pl.pallas_call(
        gcn1_kernel,
        out_shape=jax.ShapeDtypeStruct((S, GN, Hp), jnp.bfloat16),
        grid_spec=grid_spec,
        compiler_params=pltpu.CompilerParams(
            dimension_semantics=("parallel",),   # independent super-steps
            vmem_limit_bytes=64 << 20,
        ),
    )(adj_s, h0_s, fp["b1"], fp["w2"], fp["b2"], fp["w3"], fp["b3"])


# ----------------------------------------------------------------------------
# Host-side prep (done once per model): fuse embedding into gcn1, lane-pad Hp.
# ----------------------------------------------------------------------------
def prepare_params(params):
    H = params["w1"].shape[1]
    Hp = ((H + 127) // 128) * 128

    def pad_cols(a):
        return jnp.pad(a, ((0, 0), (0, Hp - a.shape[1])))

    def pad_rc(a):
        return jnp.pad(a, ((0, Hp - a.shape[0]), (0, Hp - a.shape[1])))

    return {
        # f32: used in the tiny host-side h0 = x @ wf + bf precompute
        "wf": pad_cols(params["we"] @ params["w1"]),
        "bf": pad_cols(params["be"] @ params["w1"]),
        # bf16 kernel operands
        "b1": pad_cols(params["b1"]).astype(jnp.bfloat16),
        "w2": pad_rc(params["w2"]).astype(jnp.bfloat16),
        "b2": pad_cols(params["b2"]).astype(jnp.bfloat16),
        "w3": pad_rc(params["w3"]).astype(jnp.bfloat16),
        "b3": pad_cols(params["b3"]).astype(jnp.bfloat16),
    }


# ----------------------------------------------------------------------------
# Glue (plain JAX): adjacency construction + symmetric normalization, packing.
# ----------------------------------------------------------------------------
def build_and_normalize_adjacency(edge_fea_idx, num_nodes):
    """O(N*M) scatter-add adjacency + symmetric normalization (f32, (N, N))."""
    N, M = edge_fea_idx.shape
    rows = jnp.broadcast_to(jnp.arange(N, dtype=jnp.int32)[:, None], (N, M))
    valid = edge_fea_idx >= 0
    cols = jnp.where(valid, edge_fea_idx, 0)
    adj = jnp.zeros((N, N), jnp.float32).at[rows, cols].add(valid.astype(jnp.float32))
    adj = adj + jnp.eye(N, dtype=jnp.float32)
    deg = adj.sum(axis=1)
    dinv = jnp.where(deg > 0, jax.lax.rsqrt(deg), 0.0)
    return dinv[:, None] * adj * dinv[None, :]


def _pack_block_diag(adj_g):
    """(G, N, N) f32 -> (G*N, G*N) bf16 block-diagonal adjacency (fused cast)."""
    G, N, _ = adj_g.shape
    eye_g = jnp.eye(G, dtype=adj_g.dtype)
    blk = adj_g[:, :, None, :] * eye_g[:, None, :, None]        # (G, N, G, N)
    return blk.reshape(G * N, G * N).astype(jnp.bfloat16)


@functools.partial(jax.jit, static_argnames=("hidden_dim",))
def _gcn1_forward_core(node_in_fea_b, edge_fea_idx_b, fused, hidden_dim):
    B, N, _ = node_in_fea_b.shape
    Hp = fused["w2"].shape[0]

    # Graphs packed per super-step so the block-diag adjacency is ~MXU height.
    G = max(1, _GN_TARGET // N)
    S = -(-B // G)                       # cdiv
    Bp = S * G
    pad = Bp - B

    # Per-graph normalized adjacency (f32).
    adj_b = jax.vmap(lambda e: build_and_normalize_adjacency(e, N))(edge_fea_idx_b)

    # Embedding fused into gcn1: h0 = (x @ We + be) @ W1 = x @ (We@W1) + be@W1.
    h0_b = node_in_fea_b.astype(jnp.float32) @ fused["wf"] + fused["bf"]   # (B, N, Hp)

    # Pad batch to a multiple of G (zero graphs are benign) and pack super-steps.
    adj_b = jnp.pad(adj_b, ((0, pad), (0, 0), (0, 0)))
    h0_b = jnp.pad(h0_b, ((0, pad), (0, 0), (0, 0)))
    adj_s = jax.vmap(_pack_block_diag)(adj_b.reshape(S, G, N, N))          # (S, GN, GN) bf16
    h0_s = h0_b.reshape(S, G * N, Hp).astype(jnp.bfloat16)                 # (S, GN, Hp) bf16

    out = gcn1_pallas(adj_s, h0_s, fused)                                  # (S, GN, Hp) bf16
    out = out.reshape(Bp, N, Hp)[:B, :, :hidden_dim]
    return out.astype(jnp.float32)


def gcn1_forward_batched(node_in_fea_b, edge_fea_idx_b, params, fused=None):
    """Batch of graphs: (B,N,F), (B,N,M) -> (B,N,H)."""
    if fused is None:
        fused = prepare_params(params)
    return _gcn1_forward_core(node_in_fea_b, edge_fea_idx_b, fused,
                              hidden_dim=params["w1"].shape[1])


def gcn1_forward(node_in_fea, edge_fea_idx, params, fused=None):
    """Single graph — matches the PyTorch GCN1.forward signature/semantics."""
    return gcn1_forward_batched(node_in_fea[None], edge_fea_idx[None], params, fused)[0]


# Pure-JAX f32 reference (unfused, unpadded) for correctness checks.
def gcn1_reference(node_in_fea, edge_fea_idx, params):
    N, _ = edge_fea_idx.shape
    adj = build_and_normalize_adjacency(edge_fea_idx, N)
    h = node_in_fea @ params["we"] + params["be"]
    h = jnp.maximum(adj @ h @ params["w1"] + params["b1"], 0.0)
    h = jnp.maximum(adj @ h @ params["w2"] + params["b2"], 0.0)
    h = adj @ h @ params["w3"] + params["b3"]
    return h


# ----------------------------------------------------------------------------
# Deterministic parameter init (PyTorch-nn.Linear-style uniform bounds).
# ----------------------------------------------------------------------------
def init_params(key, f_in, hidden):
    def linear(key, fan_in, fan_out):
        kw, kb = jax.random.split(key)
        bound = 1.0 / jnp.sqrt(jnp.float32(fan_in))
        w = jax.random.uniform(kw, (fan_in, fan_out), jnp.float32, -bound, bound)
        b = jax.random.uniform(kb, (1, fan_out), jnp.float32, -bound, bound)
        return w, b

    k0, k1, k2, k3 = jax.random.split(key, 4)
    we, be = linear(k0, f_in, hidden)
    w1, b1 = linear(k1, hidden, hidden)
    w2, b2 = linear(k2, hidden, hidden)
    w3, b3 = linear(k3, hidden, hidden)
    return {"we": we, "be": be, "w1": w1, "b1": b1,
            "w2": w2, "b2": b2, "w3": w3, "b3": b3}


if __name__ == "__main__":
    # Small shapes consistent with the module: B graphs, N nodes, M neighbors
    # each, original_node_fea_len=8, hidden_dim=32.
    B, N, M, F_IN, HIDDEN = 4, 16, 4, 8, 32

    key = jax.random.PRNGKey(0)
    k_feat, k_edge, k_param = jax.random.split(key, 3)

    node_in_fea = jax.random.normal(k_feat, (B, N, F_IN), dtype=jnp.float32)
    # neighbor indices in [-1, N); -1 means "no neighbor"
    edge_fea_idx = jax.random.randint(k_edge, (B, N, M), -1, N, dtype=jnp.int32)

    params = init_params(k_param, F_IN, HIDDEN)
    fused = prepare_params(params)     # hoisted: fuse + pad + bf16 cast once

    # Batched path: one pallas_call, G graphs packed per grid step.
    out = jax.block_until_ready(
        gcn1_forward_batched(node_in_fea, edge_fea_idx, params, fused))
    assert out.shape == (B, N, HIDDEN)

    ref = jax.block_until_ready(
        jax.vmap(lambda x, e: gcn1_reference(x, e, params))(node_in_fea, edge_fea_idx))
    max_err = float(jnp.max(jnp.abs(out - ref)))
    assert jnp.allclose(out, ref, atol=5e-2, rtol=5e-2), \
        f"batched mismatch vs reference (max abs err {max_err})"

    # Multiple super-steps (grid > 1) with a ragged final super-step.
    B2 = 9
    k_f2, k_e2 = jax.random.split(jax.random.PRNGKey(1))
    x2 = jax.random.normal(k_f2, (B2, N, F_IN), dtype=jnp.float32)
    e2 = jax.random.randint(k_e2, (B2, N, M), -1, N, dtype=jnp.int32)
    out2 = jax.block_until_ready(gcn1_forward_batched(x2, e2, params, fused))
    ref2 = jax.vmap(lambda x, e: gcn1_reference(x, e, params))(x2, e2)
    assert out2.shape == (B2, N, HIDDEN)
    assert jnp.allclose(out2, ref2, atol=5e-2, rtol=5e-2), "multi-step mismatch"

    # Single-graph path (matches the PyTorch module forward signature).
    out0 = jax.block_until_ready(
        gcn1_forward(node_in_fea[0], edge_fea_idx[0], params, fused))
    assert out0.shape == (N, HIDDEN)
    assert jnp.allclose(out0, ref[0], atol=5e-2, rtol=5e-2), "single-graph mismatch"

    print("KERNEL_OK")
</pallas_src>

<mosaic_0001>
module attributes {stable_mosaic.version = 11 : i64} {
  func.func private @main(%arg0: i32) attributes {dimension_semantics = [#tpu.dimension_semantics<core_parallel>], iteration_bounds = array<i64: 2>, tpu.core_type = #tpu.core_type<sc_scalar_subcore>, window_params = []} {
    return
  }
}

module attributes {stable_mosaic.version = 11 : i64} {
  func.func private @main(%arg0: i32) attributes {dimension_semantics = [#tpu.dimension_semantics<core_parallel>], iteration_bounds = array<i64: 2>, tpu.core_type = #tpu.core_type<sc_scalar_subcore>, window_params = []} {
    return
  }
}

module attributes {stable_mosaic.version = 11 : i64} {
  func.func @gcn1_kernel(%arg0: i32, %arg1: memref<1x128x128xbf16, #tpu.memory_space<vmem>>, %arg2: memref<1x128x128xbf16, #tpu.memory_space<vmem>>, %arg3: memref<1x128xbf16, #tpu.memory_space<vmem>>, %arg4: memref<128x128xbf16, #tpu.memory_space<vmem>>, %arg5: memref<1x128xbf16, #tpu.memory_space<vmem>>, %arg6: memref<128x128xbf16, #tpu.memory_space<vmem>>, %arg7: memref<1x128xbf16, #tpu.memory_space<vmem>>, %arg8: memref<1x128x128xbf16, #tpu.memory_space<vmem>>) attributes {dimension_semantics = [#tpu.dimension_semantics<parallel>], iteration_bounds = array<i64: 1>, scalar_prefetch = 0 : i64, scratch_operands = 0 : i64, tpu.core_type = #tpu.core_type<tc>, window_params = [{transform_indices = @transform_0, window_bounds = array<i64: 1, 128, 128>}, {transform_indices = @transform_1, window_bounds = array<i64: 1, 128, 128>}, {pipeline_mode = #tpu.pipeline_mode<synchronous>, transform_indices = @transform_2, window_bounds = array<i64: 1, 128>}, {pipeline_mode = #tpu.pipeline_mode<synchronous>, transform_indices = @transform_3, window_bounds = array<i64: 128, 128>}, {pipeline_mode = #tpu.pipeline_mode<synchronous>, transform_indices = @transform_4, window_bounds = array<i64: 1, 128>}, {pipeline_mode = #tpu.pipeline_mode<synchronous>, transform_indices = @transform_5, window_bounds = array<i64: 128, 128>}, {pipeline_mode = #tpu.pipeline_mode<synchronous>, transform_indices = @transform_6, window_bounds = array<i64: 1, 128>}, {transform_indices = @transform_7, window_bounds = array<i64: 1, 128, 128>}]} {
    %c0 = arith.constant 0 : index
    %c0_0 = arith.constant 0 : index
    %c0_1 = arith.constant 0 : index
    %0 = vector.load %arg1[%c0, %c0_0, %c0_1] : memref<1x128x128xbf16, #tpu.memory_space<vmem>>, vector<1x128x128xbf16>
    %1 = vector.shape_cast %0 : vector<1x128x128xbf16> to vector<128x128xbf16>
    %c0_2 = arith.constant 0 : index
    %c0_3 = arith.constant 0 : index
    %c0_4 = arith.constant 0 : index
    %2 = vector.load %arg2[%c0_2, %c0_3, %c0_4] : memref<1x128x128xbf16, #tpu.memory_space<vmem>>, vector<1x128x128xbf16>
    %3 = vector.shape_cast %2 : vector<1x128x128xbf16> to vector<128x128xbf16>
    %cst = arith.constant dense<0.000000e+00> : vector<128x128xf32>
    %4 = tpu.matmul %1, %3, %cst {dimension_numbers = #tpu.dot_dimension_numbers<[1], [0], [0], [1], [0, 0, 1, 1], [], []>} : vector<128x128xbf16>, vector<128x128xbf16>, vector<128x128xf32> -> vector<128x128xf32>
    %c0_5 = arith.constant 0 : index
    %c0_6 = arith.constant 0 : index
    %5 = vector.load %arg3[%c0_5, %c0_6] : memref<1x128xbf16, #tpu.memory_space<vmem>>, vector<1x128xbf16>
    %6 = arith.extf %5 : vector<1x128xbf16> to vector<1x128xf32>
    %7 = vector.broadcast %6 : vector<1x128xf32> to vector<128x128xf32>
    %8 = arith.addf %4, %7 : vector<128x128xf32>
    %cst_7 = arith.constant 0.000000e+00 : f32
    %9 = vector.broadcast %cst_7 : f32 to vector<128x128xf32>
    %10 = arith.maximumf %8, %9 : vector<128x128xf32>
    %11 = arith.truncf %10 : vector<128x128xf32> to vector<128x128xbf16>
    %cst_8 = arith.constant dense<0.000000e+00> : vector<128x128xf32>
    %12 = tpu.matmul %1, %11, %cst_8 {dimension_numbers = #tpu.dot_dimension_numbers<[1], [0], [0], [1], [0, 0, 1, 1], [], []>} : vector<128x128xbf16>, vector<128x128xbf16>, vector<128x128xf32> -> vector<128x128xf32>
    %13 = arith.truncf %12 : vector<128x128xf32> to vector<128x128xbf16>
    %c0_9 = arith.constant 0 : index
    %c0_10 = arith.constant 0 : index
    %14 = vector.load %arg4[%c0_9, %c0_10] : memref<128x128xbf16, #tpu.memory_space<vmem>>, vector<128x128xbf16>
    %cst_11 = arith.constant dense<0.000000e+00> : vector<128x128xf32>
    %15 = tpu.matmul %13, %14, %cst_11 {dimension_numbers = #tpu.dot_dimension_numbers<[1], [0], [0], [1], [0, 0, 1, 1], [], []>} : vector<128x128xbf16>, vector<128x128xbf16>, vector<128x128xf32> -> vector<128x128xf32>
    %c0_12 = arith.constant 0 : index
    %c0_13 = arith.constant 0 : index
    %16 = vector.load %arg5[%c0_12, %c0_13] : memref<1x128xbf16, #tpu.memory_space<vmem>>, vector<1x128xbf16>
    %17 = arith.extf %16 : vector<1x128xbf16> to vector<1x128xf32>
    %18 = vector.broadcast %17 : vector<1x128xf32> to vector<128x128xf32>
    %19 = arith.addf %15, %18 : vector<128x128xf32>
    %cst_14 = arith.constant 0.000000e+00 : f32
    %20 = vector.broadcast %cst_14 : f32 to vector<128x128xf32>
    %21 = arith.maximumf %19, %20 : vector<128x128xf32>
    %22 = arith.truncf %21 : vector<128x128xf32> to vector<128x128xbf16>
    %cst_15 = arith.constant dense<0.000000e+00> : vector<128x128xf32>
    %23 = tpu.matmul %1, %22, %cst_15 {dimension_numbers = #tpu.dot_dimension_numbers<[1], [0], [0], [1], [0, 0, 1, 1], [], []>} : vector<128x128xbf16>, vector<128x128xbf16>, vector<128x128xf32> -> vector<128x128xf32>
    %24 = arith.truncf %23 : vector<128x128xf32> to vector<128x128xbf16>
    %c0_16 = arith.constant 0 : index
    %c0_17 = arith.constant 0 : index
    %25 = vector.load %arg6[%c0_16, %c0_17] : memref<128x128xbf16, #tpu.memory_space<vmem>>, vector<128x128xbf16>
    %cst_18 = arith.constant dense<0.000000e+00> : vector<128x128xf32>
    %26 = tpu.matmul %24, %25, %cst_18 {dimension_numbers = #tpu.dot_dimension_numbers<[1], [0], [0], [1], [0, 0, 1, 1], [], []>} : vector<128x128xbf16>, vector<128x128xbf16>, vector<128x128xf32> -> vector<128x128xf32>
    %c0_19 = arith.constant 0 : index
    %c0_20 = arith.constant 0 : index
    %27 = vector.load %arg7[%c0_19, %c0_20] : memref<1x128xbf16, #tpu.memory_space<vmem>>, vector<1x128xbf16>
    %28 = arith.extf %27 : vector<1x128xbf16> to vector<1x128xf32>
    %29 = vector.broadcast %28 : vector<1x128xf32> to vector<128x128xf32>
    %30 = arith.addf %26, %29 : vector<128x128xf32>
    %31 = arith.truncf %30 : vector<128x128xf32> to vector<128x128xbf16>
    %c0_21 = arith.constant 0 : index
    %c0_22 = arith.constant 0 : index
    %c0_23 = arith.constant 0 : index
    %32 = vector.load %arg8[%c0_21, %c0_22, %c0_23] : memref<1x128x128xbf16, #tpu.memory_space<vmem>>, vector<1x128x128xbf16>
    %33 = vector.shape_cast %32 : vector<1x128x128xbf16> to vector<128x128xbf16>
    %34 = vector.shape_cast %31 : vector<128x128xbf16> to vector<1x128x128xbf16>
    tpu.vector_store %arg8[%c0_21, %c0_22, %c0_23], %34 {strides = array<i32>} : memref<1x128x128xbf16, #tpu.memory_space<vmem>>, vector<1x128x128xbf16>,
    return
  }
  func.func @transform_0(%arg0: i32) -> (i32, i32, i32) {
    %c0_i32 = arith.constant 0 : i32
    %c0_i32_0 = arith.constant 0 : i32
    %c0_i32_1 = arith.constant 0 : i32
    return %arg0, %c0_i32, %c0_i32_0 : i32, i32, i32
  }
  func.func @transform_1(%arg0: i32) -> (i32, i32, i32) {
    %c0_i32 = arith.constant 0 : i32
    %c0_i32_0 = arith.constant 0 : i32
    %c0_i32_1 = arith.constant 0 : i32
    return %arg0, %c0_i32, %c0_i32_0 : i32, i32, i32
  }
  func.func @transform_2(%arg0: i32) -> (i32, i32) {
    %c0_i32 = arith.constant 0 : i32
    %c0_i32_0 = arith.constant 0 : i32
    %c0_i32_1 = arith.constant 0 : i32
    return %c0_i32, %c0_i32_0 : i32, i32
  }
  func.func @transform_3(%arg0: i32) -> (i32, i32) {
    %c0_i32 = arith.constant 0 : i32
    %c0_i32_0 = arith.constant 0 : i32
    %c0_i32_1 = arith.constant 0 : i32
    return %c0_i32, %c0_i32_0 : i32, i32
  }
  func.func @transform_4(%arg0: i32) -> (i32, i32) {
    %c0_i32 = arith.constant 0 : i32
    %c0_i32_0 = arith.constant 0 : i32
    %c0_i32_1 = arith.constant 0 : i32
    return %c0_i32, %c0_i32_0 : i32, i32
  }
  func.func @transform_5(%arg0: i32) -> (i32, i32) {
    %c0_i32 = arith.constant 0 : i32
    %c0_i32_0 = arith.constant 0 : i32
    %c0_i32_1 = arith.constant 0 : i32
    return %c0_i32, %c0_i32_0 : i32, i32
  }
  func.func @transform_6(%arg0: i32) -> (i32, i32) {
    %c0_i32 = arith.constant 0 : i32
    %c0_i32_0 = arith.constant 0 : i32
    %c0_i32_1 = arith.constant 0 : i32
    return %c0_i32, %c0_i32_0 : i32, i32
  }
  func.func @transform_7(%arg0: i32) -> (i32, i32, i32) {
    %c0_i32 = arith.constant 0 : i32
    %c0_i32_0 = arith.constant 0 : i32
    %c0_i32_1 = arith.constant 0 : i32
    return %arg0, %c0_i32, %c0_i32_0 : i32, i32, i32
  }
}

</mosaic_0001>

<bundles_post_ra>
// kernel: _gcn1_forward_core.1
= control target key start
LH: loop header
LB: loop body
LE: loop exit
PB: predicated region body
PF: predicated region fallthrough
CT: control target
= control target key end

     0   :  { %12 = vsyncpa [#allocation3], 0  ;;  %s1897_s0 = inlined_call_operand.hbm [shape: bf16[1,128,128], index: 0, kind: input, shape index: {}]   ;;  %s1898_s1 = inlined_call_operand.hbm [shape: bf16[1,128,128], index: 1, kind: input, shape index: {}]   ;;  %s1899_s2 = inlined_call_operand.hbm [shape: bf16[1,128], index: 2, kind: input, shape index: {}]   ;;  %s1900_s3 = inlined_call_operand.hbm [shape: bf16[128,128], index: 3, kind: input, shape index: {}]   ;;  %s1901_s4 = inlined_call_operand.hbm [shape: bf16[1,128], index: 4, kind: input, shape index: {}]   ;;  %s1902_s5 = inlined_call_operand.hbm [shape: bf16[128,128], index: 5, kind: input, shape index: {}]   ;;  %s1903_s6 = inlined_call_operand.hbm [shape: bf16[1,128], index: 6, kind: input, shape index: {}]   ;;  %s1904_s7 = inlined_call_operand.hbm [shape: bf16[1,128,128], index: 7, kind: output, shape index: {}]  }
   0x1   :  { %13 = vsyncpa [#allocation6], 0 }
   0x2   :  { %14 = vsyncpa [#allocation9], 0 }
   0x3   :  { %15 = vsyncpa [#allocation12], 0 }
   0x4   :  { %16 = vsyncpa [#allocation4], 0  ;;  %s1635_s24 = smov [#allocation5]   ;;  %s1636_s26 = smov [#allocation8]  }
   0x5   :  { %s34_s25 = sshll.u32 %s1635_s24, 4  ;;  %s56_s27 = sshll.u32 %s1636_s26, 4  ;;  %s35_s25 = int_to_ptr.vmem [resolvable:$true] %s34_s25  ;;  %s1685_s27 = int_to_ptr.vmem [resolvable:$true] %s56_s27 }
   0x6   :  { %s1449_s30 = scalar_lea.hbm %s1898_s1, 1024 }
   0x7   :  { %p1450_p0 = scmp.ne.s32.totalorder %s1898_s1, %s1449_s30  ;;  %p1453_p1 = scmp.lt.u32.totalorder %s1449_s30, %s1898_s1 }
   0x9   :  { %p1455_p2 = pnand %p1453_p1, %p1450_p0 }
   0xb   :  { %1458 = shalt.err (!%p1455_p2)
}
   0xc   :  { %s1459_s12 = scalar_lea.vmem %s35_s25, 1024  ;;  %p1464_p4 = scmp.lt.s32.totalorder %s35_s25, %s35_s25 }
   0xd   :  { %p1460_p3 = scmp.ne.s32.totalorder %s35_s25, %s1459_s12  ;;  %p1465_p5 = scmp.lt.s32.totalorder %s1459_s12, %s1459_s12 }
   0xf   :  { %p1466_p6 = por %p1465_p5, %p1464_p4 }
  0x11   :  { %p1467_p7 = pnand %p1466_p6, %p1460_p3 }
  0x13   :  { %1470 = shalt.err (!%p1467_p7)
}
  0x14   :  { %s1637_s13 = smov 64   ;;  %s1638_s14 = smov 4  }
  0x15   :  { %40 = dma.hbm_to_vmem [thread:$0]  %s1898_s1, 1024, %s35_s25, [#allocation6], %s1637_s13, %s1637_s13, %s1638_s14  }
  0x16   :  { %s1471_s19 = scalar_lea.hbm %s1900_s3, 1024 }
  0x17   :  { %p1472_p8 = scmp.ne.s32.totalorder %s1900_s3, %s1471_s19  ;;  %p1475_p9 = scmp.lt.u32.totalorder %s1471_s19, %s1900_s3 }
  0x19   :  { %p1477_p10 = pnand %p1475_p9, %p1472_p8 }
  0x1b   :  { %1480 = shalt.err (!%p1477_p10)
}
  0x1c   :  { %s1481_s24 = scalar_lea.vmem %s1685_s27, 1024  ;;  %p1486_p12 = scmp.lt.s32.totalorder %s1685_s27, %s1685_s27 }
  0x1d   :  { %p1482_p11 = scmp.ne.s32.totalorder %s1685_s27, %s1481_s24  ;;  %p1487_p13 = scmp.lt.s32.totalorder %s1481_s24, %s1481_s24 }
  0x1f   :  { %p1488_p0 = por %p1487_p13, %p1486_p12 }
  0x21   :  { %p1489_p1 = pnand %p1488_p0, %p1482_p11 }
  0x23   :  { %1492 = shalt.err (!%p1489_p1)
}
  0x24   :  { %62 = dma.hbm_to_vmem [thread:$0]  %s1900_s3, 1024, %s1685_s27, [#allocation9], %s1637_s13, %s1637_s13, %s1638_s14  }
  0x25   :  { %s1639_s26 = smov [#allocation11]   ;;  %s1640_s29 = smov [#allocation2]  }
  0x26   :  { %s78_s28 = sshll.u32 %s1639_s26, 4  ;;  %s22_s30 = sshll.u32 %s1640_s29, 4  ;;  %s79_s28 = int_to_ptr.vmem [resolvable:$true] %s78_s28  ;;  %s1722_s30 = int_to_ptr.vmem [resolvable:$true] %s22_s30 }
  0x27   :  { %s1493_s10 = scalar_lea.hbm %s1902_s5, 1024 }
  0x28   :  { %p1494_p2 = scmp.ne.s32.totalorder %s1902_s5, %s1493_s10  ;;  %p1497_p3 = scmp.lt.u32.totalorder %s1493_s10, %s1902_s5 }
  0x2a   :  { %p1499_p4 = pnand %p1497_p3, %p1494_p2 }
  0x2c   :  { %1502 = shalt.err (!%p1499_p4)
}
  0x2d   :  { %s1503_s3 = scalar_lea.vmem %s79_s28, 1024  ;;  %p1508_p6 = scmp.lt.s32.totalorder %s79_s28, %s79_s28 }
  0x2e   :  { %p1504_p5 = scmp.ne.s32.totalorder %s79_s28, %s1503_s3  ;;  %p1509_p7 = scmp.lt.s32.totalorder %s1503_s3, %s1503_s3 }
  0x30   :  { %p1510_p8 = por %p1509_p7, %p1508_p6 }
  0x32   :  { %p1511_p9 = pnand %p1510_p8, %p1504_p5 }
  0x34   :  { %1514 = shalt.err (!%p1511_p9)
}
  0x35   :  { %84 = dma.hbm_to_vmem [thread:$0]  %s1902_s5, 1024, %s79_s28, [#allocation12], %s1637_s13, %s1637_s13, %s1638_s14  }
  0x36   :  { %s1515_s20 = scalar_lea.hbm %s1897_s0, 1024 }
  0x37   :  { %p1516_p10 = scmp.ne.s32.totalorder %s1897_s0, %s1515_s20  ;;  %p1519_p11 = scmp.lt.u32.totalorder %s1515_s20, %s1897_s0 }
  0x39   :  { %p1521_p12 = pnand %p1519_p11, %p1516_p10 }
  0x3b   :  { %1524 = shalt.err (!%p1521_p12)
}
  0x3c   :  { %s1525_s1 = scalar_lea.vmem %s1722_s30, 1024  ;;  %p1530_p0 = scmp.lt.s32.totalorder %s1722_s30, %s1722_s30 }
  0x3d   :  { %p1526_p13 = scmp.ne.s32.totalorder %s1722_s30, %s1525_s1  ;;  %p1531_p1 = scmp.lt.s32.totalorder %s1525_s1, %s1525_s1 }
  0x3f   :  { %p1532_p2 = por %p1531_p1, %p1530_p0 }
  0x41   :  { %p1533_p3 = pnand %p1532_p2, %p1526_p13 }
  0x43   :  { %1536 = shalt.err (!%p1533_p3)
}
  0x44   :  { %28 = dma.hbm_to_vmem [thread:$0]  %s1897_s0, 1024, %s1722_s30, [#allocation3], %s1637_s13, %s1637_s13, %s1638_s14  }
  0x45   :  { %s1641_s26 = smov [#allocation7]   ;;  %s1642_s29 = smov [#allocation10]  }
  0x46   :  { %s47_s28 = sshll.u32 %s1641_s26, 4  ;;  %s69_s8 = sshll.u32 %s1642_s29, 4  ;;  %s48_s28 = int_to_ptr.vmem [resolvable:$true] %s47_s28  ;;  %s70_s8 = int_to_ptr.vmem [resolvable:$true] %s69_s8 }
  0x47   :  { %s1537_s11 = scalar_lea.hbm %s1899_s2, 16 }
  0x48   :  { %p1538_p4 = scmp.ne.s32.totalorder %s1899_s2, %s1537_s11  ;;  %p1541_p5 = scmp.lt.u32.totalorder %s1537_s11, %s1899_s2 }
  0x4a   :  { %p1543_p6 = pnand %p1541_p5, %p1538_p4 }
  0x4c   :  { %1546 = shalt.err (!%p1543_p6)
}
  0x4d   :  { %s1547_s0 = scalar_lea.vmem %s48_s28, 16  ;;  %s1551_s30 = scalar_lea.vmem %s48_s28, 32 }
  0x4e   :  { %p1548_p7 = scmp.ne.s32.totalorder %s48_s28, %s1547_s0  ;;  %p1552_p8 = scmp.lt.s32.totalorder %s48_s28, %s48_s28 }
  0x4f   :  { %p1553_p9 = scmp.lt.s32.totalorder %s1551_s30, %s1547_s0 }
  0x51   :  { %p1554_p10 = por %p1553_p9, %p1552_p8 }
  0x53   :  { %p1555_p11 = pnand %p1554_p10, %p1548_p7 }
  0x55   :  { %1558 = shalt.err (!%p1555_p11)
}
  0x56   :  { %50 = dma.hbm_to_vmem [thread:$0]  %s1899_s2, 16, %s48_s28, [#allocation6]  }
  0x57   :  { %s1559_s20 = scalar_lea.hbm %s1901_s4, 16 }
  0x58   :  { %p1560_p12 = scmp.ne.s32.totalorder %s1901_s4, %s1559_s20  ;;  %p1563_p13 = scmp.lt.u32.totalorder %s1559_s20, %s1901_s4 }
  0x5a   :  { %p1565_p0 = pnand %p1563_p13, %p1560_p12 }
  0x5c   :  { %1568 = shalt.err (!%p1565_p0)
}
  0x5d   :  { %s1569_s1 = scalar_lea.vmem %s70_s8, 16  ;;  %s1573_s5 = scalar_lea.vmem %s70_s8, 32 }
  0x5e   :  { %p1570_p1 = scmp.ne.s32.totalorder %s70_s8, %s1569_s1  ;;  %p1574_p2 = scmp.lt.s32.totalorder %s70_s8, %s70_s8 }
  0x5f   :  { %p1575_p3 = scmp.lt.s32.totalorder %s1573_s5, %s1569_s1 }
  0x61   :  { %p1576_p4 = por %p1575_p3, %p1574_p2 }
  0x63   :  { %p1577_p5 = pnand %p1576_p4, %p1570_p1 }
  0x65   :  { %1580 = shalt.err (!%p1577_p5)
}
  0x66   :  { %72 = dma.hbm_to_vmem [thread:$0]  %s1901_s4, 16, %s70_s8, [#allocation9]  }
  0x67   :  { %s1643_s26 = smov [#allocation13]   ;;  %s1581_s10 = scalar_lea.hbm %s1903_s6, 16 }
  0x68   :  { %s91_s28 = sshll.u32 %s1643_s26, 4  ;;  %p1582_p6 = scmp.ne.s32.totalorder %s1903_s6, %s1581_s10  ;;  %s92_s28 = int_to_ptr.vmem [resolvable:$true] %s91_s28 }
  0x69   :  { %p1585_p7 = scmp.lt.u32.totalorder %s1581_s10, %s1903_s6 }
  0x6b   :  { %p1587_p8 = pnand %p1585_p7, %p1582_p6 }
  0x6d   :  { %1590 = shalt.err (!%p1587_p8)
}
  0x6e   :  { %s1591_s3 = scalar_lea.vmem %s92_s28, 16  ;;  %s1595_s4 = scalar_lea.vmem %s92_s28, 32 }
  0x6f   :  { %p1592_p9 = scmp.ne.s32.totalorder %s92_s28, %s1591_s3  ;;  %p1596_p10 = scmp.lt.s32.totalorder %s92_s28, %s92_s28 }
  0x70   :  { %p1597_p11 = scmp.lt.s32.totalorder %s1595_s4, %s1591_s3 }
  0x72   :  { %p1598_p12 = por %p1597_p11, %p1596_p10 }
  0x74   :  { %p1599_p13 = pnand %p1598_p12, %p1592_p9 }
  0x76   :  { %1602 = shalt.err (!%p1599_p13)
}
  0x77   :  { %94 = dma.hbm_to_vmem [thread:$0]  %s1903_s6, 16, %s92_s28, [#allocation12]  }
  0x78   :  { %1625 = dma.done.wait [#allocation3], 1024  }
  0x79   :  { %1626 = vsyncadd [#allocation3], 4294966272 }
  0x7a   :  { %1627 = dma.done.wait [#allocation6], 1040  }
  0x7b   :  { %1628 = vsyncadd [#allocation6], 4294966256 }
  0x7c   :  { %1629 = dma.done.wait [#allocation9], 1040  }
  0x7d   :  { %1630 = vsyncadd [#allocation9], 4294966256 }
  0x7e   :  { %1631 = dma.done.wait [#allocation12], 1040  }
  0x7f   :  { %1632 = vsyncadd [#allocation12], 4294966256  ;;  %v1417_v0 = vld [vmem:[#allocation5] sm:$0xff]   ;;  %v1418_v1 = vld [vmem:[#allocation5 + $0x8] sm:$0xff]   ;;  %v151_v23 = vlaneseq  ;;  %s1644_s6 = smov [#allocation14]  }
  0x80   :  { %1231 = vmatprep.subr.bf16.mxu0 %v1417_v0  ;;  %v1419_v2 = vld [vmem:[#allocation5 + $0x10] sm:$0xff]   ;;  %v1420_v3 = vld [vmem:[#allocation5 + $0x18] sm:$0xff]   ;;  %v1795_v4 = vld [vmem:[#allocation2] sm:$0xff]   ;;  %s1025_s30 = sshll.u32 %s1644_s6, 4  ;;  %s1026_s30 = int_to_ptr.vmem [resolvable:$true] %s1025_s30 }
  0x81   :  { %1232 = vmatpush3.bf16.msra.mxu0 %v1417_v0  ;;  %1247 = vmatprep.mubr.bf16.mxu0 %v1795_v4  ;;  %v1421_v5 = vld [vmem:[#allocation5 + $0x20] sm:$0xff]   ;;  %v1422_v6 = vld [vmem:[#allocation5 + $0x28] sm:$0xff]   ;;  %v1423_v7 = vld [vmem:[#allocation5 + $0x30] sm:$0xff]   ;;  %v152_v24 = vshrl.u32 %v151_v23, 7  ;;  %s1603_s27 = scalar_lea.vmem %s1026_s30, 1024  ;;  %p1608_p1 = scmp.lt.s32.totalorder %s1026_s30, %s1026_s30 }
  0x82   :  { %1233 = vmatprep.subr.bf16.mxu0 %v1418_v1  ;;  %1279 = vmatprep.mubr.bf16.mxu1 %v1795_v4  ;;  %v1424_v8 = vld [vmem:[#allocation5 + $0x38] sm:$0xff]   ;;  %v1799_v9 = vld [vmem:[#allocation2 + $0x8] sm:$0xff]   ;;  %v1801_v10 = vld [vmem:[#allocation2 + $0x10] sm:$0xff]   ;;  %p1604_p0 = scmp.ne.s32.totalorder %s1026_s30, %s1603_s27  ;;  %p1609_p2 = scmp.lt.s32.totalorder %s1603_s27, %s1603_s27 }
  0x83   :  { %v1805_v11 = vld [vmem:[#allocation2 + $0x18] sm:$0xff]   ;;  %v1807_v12 = vld [vmem:[#allocation2 + $0x20] sm:$0xff]   ;;  %v1811_v13 = vld [vmem:[#allocation2 + $0x28] sm:$0xff]   ;;  %v1820_v27 = vsub.s32 0, %v152_v24 }
  0x84   :  { %v1813_v14 = vld [vmem:[#allocation2 + $0x30] sm:$0xff]   ;;  %v1817_v15 = vld [vmem:[#allocation2 + $0x38] sm:$0xff]   ;;  %v1433_v16 = vld [vmem:[#allocation8] sm:$0xff]   ;;  %p1610_p3 = por %p1609_p2, %p1608_p1 }
  0x85   :  { %1234 = vmatpush3.bf16.msra.mxu0 %v1418_v1  ;;  %v1434_v17 = vld [vmem:[#allocation8 + $0x8] sm:$0xff]   ;;  %v1435_v18 = vld [vmem:[#allocation8 + $0x10] sm:$0xff]   ;;  %v1436_v19 = vld [vmem:[#allocation8 + $0x18] sm:$0xff]  }
  0x86   :  { %1235 = vmatprep.subr.bf16.mxu0 %v1419_v2  ;;  %v1437_v20 = vld [vmem:[#allocation8 + $0x20] sm:$0xff]   ;;  %v1438_v21 = vld [vmem:[#allocation8 + $0x28] sm:$0xff]   ;;  %v1439_v22 = vld [vmem:[#allocation8 + $0x30] sm:$0xff]   ;;  %p1611_p4 = pnand %p1610_p3, %p1604_p0 }
  0x87   :  { %v149_v25 = vld [vmem:[#allocation7] sm:$0x1] }
  0x88   :  { %v150_v26 = vunpack.c.l.bf16 %v149_v25 }
  0x89   :  { %1236 = vmatpush3.bf16.msra.mxu0 %v1419_v2 }
  0x8a   :  { %1237 = vmatprep.subr.bf16.mxu0 %v1420_v3  ;;  %v154_v28 = vrot.slane %v150_v26, %v1820_v27 }
  0x8d   :  { %1238 = vmatpush3.bf16.msra.mxu0 %v1420_v3 }
  0x8e   :  { %1239 = vmatprep.subr.bf16.mxu0 %v1421_v5 }
  0x91   :  { %1240 = vmatpush3.bf16.msra.mxu0 %v1421_v5 }
  0x92   :  { %1241 = vmatprep.subr.bf16.mxu0 %v1422_v6 }
  0x95   :  { %1242 = vmatpush3.bf16.msra.mxu0 %v1422_v6 }
  0x96   :  { %1243 = vmatprep.subr.bf16.mxu0 %v1423_v7 }
  0x99   :  { %1244 = vmatpush3.bf16.msra.mxu0 %v1423_v7 }
  0x9a   :  { %1245 = vmatprep.subr.bf16.mxu0 %v1424_v8 }
  0x9d   :  { %1246 = vmatpush3.bf16.msra.mxu0 %v1424_v8 }
  0x9e   :  { %1295 = vmatprep.subr.bf16.mxu0 %v1433_v16 }
  0xa0   :  { %1248 = vmatmul.mubr.bf16.vlgmr.msra.gmra.mrb[0].mxu0 %v1799_v9 }
  0xa1   :  { %1251 = vmatprep.mubr.bf16.mxu0 %v1801_v10  ;;  %1296 = vmatpush3.bf16.msra.mxu0 %v1433_v16 }
  0xa2   :  { %1297 = vmatprep.subr.bf16.mxu0 %v1434_v17 }
  0xa5   :  { %1298 = vmatpush3.bf16.msra.mxu0 %v1434_v17 }
  0xa6   :  { %1299 = vmatprep.subr.bf16.mxu0 %v1435_v18 }
  0xa8   :  { %1252 = vmatmul.mubr.bf16.gmra.mrb[4].mxu0 %v1805_v11 }
  0xa9   :  { %1255 = vmatprep.mubr.bf16.mxu0 %v1807_v12  ;;  %1300 = vmatpush3.bf16.msra.mxu0 %v1435_v18 }
  0xaa   :  { %1301 = vmatprep.subr.bf16.mxu0 %v1436_v19 }
  0xad   :  { %1302 = vmatpush3.bf16.msra.mxu0 %v1436_v19 }
  0xae   :  { %1303 = vmatprep.subr.bf16.mxu0 %v1437_v20 }
  0xb0   :  { %1256 = vmatmul.mubr.bf16.gmra.mrb[8].mxu0 %v1811_v13 }
  0xb1   :  { %1259 = vmatprep.mubr.bf16.mxu0 %v1813_v14  ;;  %1304 = vmatpush3.bf16.msra.mxu0 %v1437_v20 }
  0xb2   :  { %1305 = vmatprep.subr.bf16.mxu0 %v1438_v21 }
  0xb5   :  { %1306 = vmatpush3.bf16.msra.mxu0 %v1438_v21 }
  0xb6   :  { %1307 = vmatprep.subr.bf16.mxu0 %v1439_v22 }
  0xb8   :  { %1260 = vmatmul.mubr.bf16.gmra.mrb[12].mxu0 %v1817_v15 }
  0xb9   :  { %1308 = vmatpush3.bf16.msra.mxu0 %v1439_v22 }
 0x173   :  { %v1249_v29 = vpop.f32.mrb[0].mxu0 }
 0x174   :  { %v294_v30 = vadd.f32 %v1249_v29, %v154_v28  ;;  %v285_v31 = vpop.f32.mrb[1].mxu0 }
 0x175   :  { %v286_v32 = vadd.f32 %v285_v31, %v154_v28  ;;  %v1250_v33 = vpop.f32.mrb[2].mxu0 }
 0x176   :  { %v297_v34 = vadd.f32 %v1250_v33, %v154_v28  ;;  %v288_v35 = vpop.f32.mrb[3].mxu0  ;;  %v350_v37 = vmax.f32 %v294_v30, 0.0 }
 0x177   :  { %v289_v36 = vadd.f32 %v288_v35, %v154_v28  ;;  %v348_v39 = vmax.f32 %v286_v32, 0.0 }
 0x178   :  { %v351_v38 = vmax.f32 %v297_v34, 0.0 }
 0x179   :  { %v349_v40 = vmax.f32 %v289_v36, 0.0 }
 0x17a   :  { %v365_v41 = vpack.c.bf16 %v351_v38, %v350_v37 }
 0x17b   :  { %v1253_v42 = vpop.f32.mrb[4].mxu0  ;;  %v364_v43 = vpack.c.bf16 %v349_v40, %v348_v39 }
 0x17c   :  { %v310_v44 = vadd.f32 %v1253_v42, %v154_v28  ;;  %v301_v45 = vpop.f32.mrb[5].mxu0 }
 0x17d   :  { %v302_v46 = vadd.f32 %v301_v45, %v154_v28  ;;  %v1254_v47 = vpop.f32.mrb[6].mxu0  ;;  %1263 = vmatprep.subr.bf16.mxu1 %v364_v43 }
 0x17e   :  { %v313_v48 = vadd.f32 %v1254_v47, %v154_v28  ;;  %v304_v49 = vpop.f32.mrb[7].mxu0  ;;  %1264 = vmatpush3.bf16.msra.mxu1 %v364_v43  ;;  %v354_v51 = vmax.f32 %v310_v44, 0.0 }
 0x17f   :  { %v305_v50 = vadd.f32 %v304_v49, %v154_v28  ;;  %1265 = vmatprep.subr.bf16.mxu1 %v365_v41  ;;  %v352_v53 = vmax.f32 %v302_v46, 0.0 }
 0x180   :  { %v355_v52 = vmax.f32 %v313_v48, 0.0 }
 0x181   :  { %v353_v54 = vmax.f32 %v305_v50, 0.0 }
 0x182   :  { %v367_v55 = vpack.c.bf16 %v355_v52, %v354_v51  ;;  %1266 = vmatpush3.bf16.msra.mxu1 %v365_v41 }
 0x183   :  { %v366_v56 = vpack.c.bf16 %v353_v54, %v352_v53  ;;  %v1257_v57 = vpop.f32.mrb[8].mxu0  ;;  %v1831_v54 = vld [vmem:[#allocation11] sm:$0xff]  }
 0x184   :  { %v326_v58 = vadd.f32 %v1257_v57, %v154_v28  ;;  %v317_v59 = vpop.f32.mrb[9].mxu0  ;;  %v1842_v57 = vld [vmem:[#allocation11 + $0x18] sm:$0xff]  }
 0x185   :  { %v318_v60 = vadd.f32 %v317_v59, %v154_v28  ;;  %v1258_v61 = vpop.f32.mrb[10].mxu0  ;;  %1267 = vmatprep.subr.bf16.mxu1 %v366_v56  ;;  %v1850_v59 = vld [vmem:[#allocation11 + $0x28] sm:$0xff]  }
 0x186   :  { %v329_v62 = vadd.f32 %v1258_v61, %v154_v28  ;;  %v320_v63 = vpop.f32.mrb[11].mxu0  ;;  %1268 = vmatpush3.bf16.msra.mxu1 %v366_v56  ;;  %v358_v1 = vmax.f32 %v326_v58, 0.0  ;;  %v1838_v56 = vld [vmem:[#allocation11 + $0x10] sm:$0xff]   ;;  %v1846_v58 = vld [vmem:[#allocation11 + $0x20] sm:$0xff]   ;;  %v493_v61 = vld [vmem:[#allocation10] sm:$0x1] }
 0x187   :  { %v321_v0 = vadd.f32 %v320_v63, %v154_v28  ;;  %1269 = vmatprep.subr.bf16.mxu1 %v367_v55  ;;  %v356_v3 = vmax.f32 %v318_v60, 0.0  ;;  %v1854_v60 = vld [vmem:[#allocation11 + $0x30] sm:$0xff]  }
 0x188   :  { %v359_v2 = vmax.f32 %v329_v62, 0.0  ;;  %v494_v62 = vunpack.c.l.bf16 %v493_v61 }
 0x189   :  { %v357_v5 = vmax.f32 %v321_v0, 0.0 }
 0x18a   :  { %v369_v6 = vpack.c.bf16 %v359_v2, %v358_v1  ;;  %1270 = vmatpush3.bf16.msra.mxu1 %v367_v55  ;;  %v1833_v55 = vld [vmem:[#allocation11 + $0x8] sm:$0xff]   ;;  %v498_v63 = vrot.slane %v494_v62, %v1820_v27 }
 0x18b   :  { %v368_v7 = vpack.c.bf16 %v357_v5, %v356_v3  ;;  %v1261_v8 = vpop.f32.mrb[12].mxu0 }
 0x18c   :  { %v342_v16 = vadd.f32 %v1261_v8, %v154_v28  ;;  %v333_v17 = vpop.f32.mrb[13].mxu0 }
 0x18d   :  { %v334_v18 = vadd.f32 %v333_v17, %v154_v28  ;;  %v1262_v19 = vpop.f32.mrb[14].mxu0  ;;  %1271 = vmatprep.subr.bf16.mxu1 %v368_v7 }
 0x18e   :  { %v345_v20 = vadd.f32 %v1262_v19, %v154_v28  ;;  %v336_v21 = vpop.f32.mrb[15].mxu0  ;;  %1272 = vmatpush3.bf16.msra.mxu1 %v368_v7  ;;  %v362_v23 = vmax.f32 %v342_v16, 0.0 }
 0x18f   :  { %v337_v22 = vadd.f32 %v336_v21, %v154_v28  ;;  %1273 = vmatprep.subr.bf16.mxu1 %v369_v6  ;;  %v360_v25 = vmax.f32 %v334_v18, 0.0  ;;  %v1440_v28 = vld [vmem:[#allocation8 + $0x38] sm:$0xff]  }
 0x190   :  { %v363_v24 = vmax.f32 %v345_v20, 0.0  ;;  %1309 = vmatprep.subr.bf16.mxu0 %v1440_v28 }
 0x191   :  { %v361_v26 = vmax.f32 %v337_v22, 0.0  ;;  %1310 = vmatpush3.bf16.msra.mxu0 %v1440_v28 }
 0x192   :  { %v371_v29 = vpack.c.bf16 %v363_v24, %v362_v23  ;;  %1274 = vmatpush3.bf16.msra.mxu1 %v369_v6  ;;  %1359 = vmatprep.subr.bf16.mxu0 %v1831_v54 }
 0x193   :  { %v370_v30 = vpack.c.bf16 %v361_v26, %v360_v25 }
 0x195   :  { %1275 = vmatprep.subr.bf16.mxu1 %v370_v30 }
 0x196   :  { %1276 = vmatpush3.bf16.msra.mxu1 %v370_v30 }
 0x197   :  { %1277 = vmatprep.subr.bf16.mxu1 %v371_v29 }
 0x19a   :  { %1278 = vmatpush3.bf16.msra.mxu1 %v371_v29 }
 0x19d   :  { %1280 = vmatmul.mubr.bf16.vlgmr.msra.gmra.mrb[0].mxu1 %v1799_v9 }
 0x19e   :  { %1283 = vmatprep.mubr.bf16.mxu1 %v1801_v10 }
 0x1a5   :  { %1284 = vmatmul.mubr.bf16.gmra.mrb[4].mxu1 %v1805_v11 }
 0x1a6   :  { %1287 = vmatprep.mubr.bf16.mxu1 %v1807_v12 }
 0x1ad   :  { %1288 = vmatmul.mubr.bf16.gmra.mrb[8].mxu1 %v1811_v13 }
 0x1ae   :  { %1291 = vmatprep.mubr.bf16.mxu1 %v1813_v14 }
 0x1b5   :  { %1292 = vmatmul.mubr.bf16.gmra.mrb[12].mxu1 %v1817_v15 }
 0x1b6   :  { %1343 = vmatprep.mubr.bf16.mxu1 %v1795_v4 }
 0x270   :  { %v1281_v31 = vpop.f32.mrb[0].mxu1 }
 0x271   :  { %v406_v32 = vpop.f32.mrb[1].mxu1 }
 0x272   :  { %v1282_v33 = vpop.f32.mrb[2].mxu1 }
 0x273   :  { %v470_v34 = vpack.c.bf16 %v1282_v33, %v1281_v31  ;;  %v409_v35 = vpop.f32.mrb[3].mxu1 }
 0x274   :  { %v469_v36 = vpack.c.bf16 %v409_v35, %v406_v32 }
 0x276   :  { %1311 = vmatprep.mubr.bf16.mxu0 %v469_v36 }
 0x277   :  { %1312 = vmatmul.mubr.bf16.vlgmr.msra.gmra.mrb[16].mxu0 %v470_v34 }
 0x278   :  { %v1285_v37 = vpop.f32.mrb[4].mxu1  ;;  %1360 = vmatpush3.bf16.msra.mxu0 %v1831_v54 }
 0x279   :  { %v422_v38 = vpop.f32.mrb[5].mxu1  ;;  %1361 = vmatprep.subr.bf16.mxu0 %v1833_v55 }
 0x27a   :  { %v1286_v39 = vpop.f32.mrb[6].mxu1 }
 0x27b   :  { %v472_v40 = vpack.c.bf16 %v1286_v39, %v1285_v37  ;;  %v425_v41 = vpop.f32.mrb[7].mxu1 }
 0x27c   :  { %v471_v42 = vpack.c.bf16 %v425_v41, %v422_v38  ;;  %1362 = vmatpush3.bf16.msra.mxu0 %v1833_v55 }
 0x27d   :  { %1363 = vmatprep.subr.bf16.mxu0 %v1838_v56 }
 0x27e   :  { %1315 = vmatprep.mubr.bf16.mxu0 %v471_v42 }
 0x27f   :  { %1316 = vmatmul.mubr.bf16.gmra.mrb[20].mxu0 %v472_v40 }
 0x280   :  { %v1289_v4 = vpop.f32.mrb[8].mxu1  ;;  %1364 = vmatpush3.bf16.msra.mxu0 %v1838_v56 }
 0x281   :  { %v438_v43 = vpop.f32.mrb[9].mxu1  ;;  %1365 = vmatprep.subr.bf16.mxu0 %v1842_v57 }
 0x282   :  { %v1290_v44 = vpop.f32.mrb[10].mxu1 }
 0x283   :  { %v474_v45 = vpack.c.bf16 %v1290_v44, %v1289_v4  ;;  %v441_v46 = vpop.f32.mrb[11].mxu1 }
 0x284   :  { %v473_v47 = vpack.c.bf16 %v441_v46, %v438_v43  ;;  %1366 = vmatpush3.bf16.msra.mxu0 %v1842_v57 }
 0x285   :  { %1367 = vmatprep.subr.bf16.mxu0 %v1846_v58 }
 0x286   :  { %1319 = vmatprep.mubr.bf16.mxu0 %v473_v47 }
 0x287   :  { %1320 = vmatmul.mubr.bf16.gmra.mrb[24].mxu0 %v474_v45 }
 0x288   :  { %v1293_v48 = vpop.f32.mrb[12].mxu1  ;;  %1368 = vmatpush3.bf16.msra.mxu0 %v1846_v58 }
 0x289   :  { %v454_v49 = vpop.f32.mrb[13].mxu1  ;;  %1369 = vmatprep.subr.bf16.mxu0 %v1850_v59 }
 0x28a   :  { %v1294_v50 = vpop.f32.mrb[14].mxu1 }
 0x28b   :  { %v476_v51 = vpack.c.bf16 %v1294_v50, %v1293_v48  ;;  %v457_v52 = vpop.f32.mrb[15].mxu1 }
 0x28c   :  { %v475_v53 = vpack.c.bf16 %v457_v52, %v454_v49  ;;  %1370 = vmatpush3.bf16.msra.mxu0 %v1850_v59 }
 0x28d   :  { %1371 = vmatprep.subr.bf16.mxu0 %v1854_v60 }
 0x28e   :  { %1323 = vmatprep.mubr.bf16.mxu0 %v475_v53 }
 0x28f   :  { %1324 = vmatmul.mubr.bf16.gmra.mrb[28].mxu0 %v476_v51 }
 0x290   :  { %1372 = vmatpush3.bf16.msra.mxu0 %v1854_v60 }
 0x34a   :  { %v1313_v0 = vpop.f32.mrb[16].mxu0 }
 0x34b   :  { %v590_v1 = vadd.f32 %v1313_v0, %v498_v63  ;;  %v581_v2 = vpop.f32.mrb[17].mxu0 }
 0x34c   :  { %v582_v3 = vadd.f32 %v581_v2, %v498_v63  ;;  %v1314_v5 = vpop.f32.mrb[18].mxu0 }
 0x34d   :  { %v593_v6 = vadd.f32 %v1314_v5, %v498_v63  ;;  %v584_v7 = vpop.f32.mrb[19].mxu0  ;;  %v646_v16 = vmax.f32 %v590_v1, 0.0 }
 0x34e   :  { %v585_v8 = vadd.f32 %v584_v7, %v498_v63  ;;  %v644_v18 = vmax.f32 %v582_v3, 0.0 }
 0x34f   :  { %v647_v17 = vmax.f32 %v593_v6, 0.0 }
 0x350   :  { %v645_v19 = vmax.f32 %v585_v8, 0.0 }
 0x351   :  { %v661_v20 = vpack.c.bf16 %v647_v17, %v646_v16 }
 0x352   :  { %v660_v21 = vpack.c.bf16 %v645_v19, %v644_v18  ;;  %v1317_v22 = vpop.f32.mrb[20].mxu0 }
 0x353   :  { %v606_v23 = vadd.f32 %v1317_v22, %v498_v63  ;;  %v597_v24 = vpop.f32.mrb[21].mxu0 }
 0x354   :  { %v598_v25 = vadd.f32 %v597_v24, %v498_v63  ;;  %v1318_v26 = vpop.f32.mrb[22].mxu0  ;;  %1327 = vmatprep.subr.bf16.mxu1 %v660_v21 }
 0x355   :  { %v609_v29 = vadd.f32 %v1318_v26, %v498_v63  ;;  %v600_v30 = vpop.f32.mrb[23].mxu0  ;;  %1328 = vmatpush3.bf16.msra.mxu1 %v660_v21  ;;  %v650_v31 = vmax.f32 %v606_v23, 0.0  ;;  %v789_v26 = vld [vmem:[#allocation13] sm:$0x1] }
 0x356   :  { %v601_v28 = vadd.f32 %v600_v30, %v498_v63  ;;  %1329 = vmatprep.subr.bf16.mxu1 %v661_v20  ;;  %v648_v33 = vmax.f32 %v598_v25, 0.0 }
 0x357   :  { %v651_v32 = vmax.f32 %v609_v29, 0.0  ;;  %v790_v29 = vunpack.c.l.bf16 %v789_v26 }
 0x358   :  { %v649_v34 = vmax.f32 %v601_v28, 0.0 }
 0x359   :  { %v663_v35 = vpack.c.bf16 %v651_v32, %v650_v31  ;;  %1330 = vmatpush3.bf16.msra.mxu1 %v661_v20  ;;  %v794_v30 = vrot.slane %v790_v29, %v1820_v27 }
 0x35a   :  { %v662_v36 = vpack.c.bf16 %v649_v34, %v648_v33  ;;  %v1321_v37 = vpop.f32.mrb[24].mxu0 }
 0x35b   :  { %v622_v38 = vadd.f32 %v1321_v37, %v498_v63  ;;  %v613_v39 = vpop.f32.mrb[25].mxu0 }
 0x35c   :  { %v614_v40 = vadd.f32 %v613_v39, %v498_v63  ;;  %v1322_v41 = vpop.f32.mrb[26].mxu0  ;;  %1331 = vmatprep.subr.bf16.mxu1 %v662_v36 }
 0x35d   :  { %v625_v42 = vadd.f32 %v1322_v41, %v498_v63  ;;  %v616_v4 = vpop.f32.mrb[27].mxu0  ;;  %1332 = vmatpush3.bf16.msra.mxu1 %v662_v36  ;;  %v654_v44 = vmax.f32 %v622_v38, 0.0 }
 0x35e   :  { %v617_v43 = vadd.f32 %v616_v4, %v498_v63  ;;  %1333 = vmatprep.subr.bf16.mxu1 %v663_v35  ;;  %v652_v46 = vmax.f32 %v614_v40, 0.0 }
 0x35f   :  { %v655_v45 = vmax.f32 %v625_v42, 0.0 }
 0x360   :  { %v653_v47 = vmax.f32 %v617_v43, 0.0 }
 0x361   :  { %v665_v48 = vpack.c.bf16 %v655_v45, %v654_v44  ;;  %1334 = vmatpush3.bf16.msra.mxu1 %v663_v35 }
 0x362   :  { %v664_v49 = vpack.c.bf16 %v653_v47, %v652_v46  ;;  %v1325_v50 = vpop.f32.mrb[28].mxu0 }
 0x363   :  { %v638_v51 = vadd.f32 %v1325_v50, %v498_v63  ;;  %v629_v52 = vpop.f32.mrb[29].mxu0 }
 0x364   :  { %v630_v53 = vadd.f32 %v629_v52, %v498_v63  ;;  %v1326_v61 = vpop.f32.mrb[30].mxu0  ;;  %1335 = vmatprep.subr.bf16.mxu1 %v664_v49 }
 0x365   :  { %v641_v62 = vadd.f32 %v1326_v61, %v498_v63  ;;  %v632_v0 = vpop.f32.mrb[31].mxu0  ;;  %1336 = vmatpush3.bf16.msra.mxu1 %v664_v49  ;;  %v658_v2 = vmax.f32 %v638_v51, 0.0 }
 0x366   :  { %v633_v1 = vadd.f32 %v632_v0, %v498_v63  ;;  %1337 = vmatprep.subr.bf16.mxu1 %v665_v48  ;;  %v656_v5 = vmax.f32 %v630_v53, 0.0 }
 0x367   :  { %v659_v3 = vmax.f32 %v641_v62, 0.0 }
 0x368   :  { %v657_v6 = vmax.f32 %v633_v1, 0.0 }
 0x369   :  { %v667_v7 = vpack.c.bf16 %v659_v3, %v658_v2  ;;  %1338 = vmatpush3.bf16.msra.mxu1 %v665_v48 }
 0x36a   :  { %v666_v8 = vpack.c.bf16 %v657_v6, %v656_v5 }
 0x36c   :  { %1339 = vmatprep.subr.bf16.mxu1 %v666_v8 }
 0x36d   :  { %1340 = vmatpush3.bf16.msra.mxu1 %v666_v8 }
 0x36e   :  { %1341 = vmatprep.subr.bf16.mxu1 %v667_v7 }
 0x371   :  { %1342 = vmatpush3.bf16.msra.mxu1 %v667_v7 }
 0x372   :  { %1391 = vmatprep.subr.bf16.mxu1 %v1831_v54 }
 0x374   :  { %1344 = vmatmul.mubr.bf16.vlgmr.msra.gmra.mrb[16].mxu1 %v1799_v9  ;;  %v1448_v9 = vld [vmem:[#allocation11 + $0x38] sm:$0xff]  }
 0x375   :  { %1347 = vmatprep.mubr.bf16.mxu1 %v1801_v10  ;;  %1399 = vmatpush3.bf16.msra.mxu1 %v1831_v54 }
 0x376   :  { %1392 = vmatprep.subr.bf16.mxu1 %v1833_v55  ;;  %1373 = vmatprep.subr.bf16.mxu0 %v1448_v9 }
 0x377   :  { %1374 = vmatpush3.bf16.msra.mxu0 %v1448_v9 }
 0x379   :  { %1400 = vmatpush3.bf16.msra.mxu1 %v1833_v55 }
 0x37a   :  { %1393 = vmatprep.subr.bf16.mxu1 %v1838_v56 }
 0x37c   :  { %1348 = vmatmul.mubr.bf16.gmra.mrb[20].mxu1 %v1805_v11 }
 0x37d   :  { %1351 = vmatprep.mubr.bf16.mxu1 %v1807_v12  ;;  %1401 = vmatpush3.bf16.msra.mxu1 %v1838_v56 }
 0x37e   :  { %1394 = vmatprep.subr.bf16.mxu1 %v1842_v57 }
 0x381   :  { %1402 = vmatpush3.bf16.msra.mxu1 %v1842_v57 }
 0x382   :  { %1395 = vmatprep.subr.bf16.mxu1 %v1846_v58 }
 0x384   :  { %1352 = vmatmul.mubr.bf16.gmra.mrb[24].mxu1 %v1811_v13 }
 0x385   :  { %1355 = vmatprep.mubr.bf16.mxu1 %v1813_v14  ;;  %1403 = vmatpush3.bf16.msra.mxu1 %v1846_v58 }
 0x386   :  { %1396 = vmatprep.subr.bf16.mxu1 %v1850_v59 }
 0x389   :  { %1404 = vmatpush3.bf16.msra.mxu1 %v1850_v59 }
 0x38a   :  { %1397 = vmatprep.subr.bf16.mxu1 %v1854_v60 }
 0x38c   :  { %1356 = vmatmul.mubr.bf16.gmra.mrb[28].mxu1 %v1817_v15 }
 0x38d   :  { %1405 = vmatpush3.bf16.msra.mxu1 %v1854_v60 }
 0x38e   :  { %1398 = vmatprep.subr.bf16.mxu1 %v1448_v9 }
 0x391   :  { %1406 = vmatpush3.bf16.msra.mxu1 %v1448_v9 }
 0x447   :  { %v1345_v10 = vpop.f32.mrb[16].mxu1 }
 0x448   :  { %v702_v11 = vpop.f32.mrb[17].mxu1 }
 0x449   :  { %v1346_v12 = vpop.f32.mrb[18].mxu1 }
 0x44a   :  { %v766_v13 = vpack.c.bf16 %v1346_v12, %v1345_v10  ;;  %v705_v14 = vpop.f32.mrb[19].mxu1 }
 0x44b   :  { %v765_v54 = vpack.c.bf16 %v705_v14, %v702_v11 }
 0x44d   :  { %1375 = vmatprep.mubr.bf16.mxu0 %v765_v54 }
 0x44e   :  { %1376 = vmatmul.mubr.bf16.vlgmr.msra.gmra.mrb[32].mxu0 %v766_v13 }
 0x44f   :  { %v1349_v55 = vpop.f32.mrb[20].mxu1 }
 0x450   :  { %v718_v56 = vpop.f32.mrb[21].mxu1 }
 0x451   :  { %v1350_v57 = vpop.f32.mrb[22].mxu1 }
 0x452   :  { %v768_v58 = vpack.c.bf16 %v1350_v57, %v1349_v55  ;;  %v721_v15 = vpop.f32.mrb[23].mxu1 }
 0x453   :  { %v767_v59 = vpack.c.bf16 %v721_v15, %v718_v56 }
 0x455   :  { %1379 = vmatprep.mubr.bf16.mxu0 %v767_v59 }
 0x456   :  { %1380 = vmatmul.mubr.bf16.gmra.mrb[36].mxu0 %v768_v58 }
 0x457   :  { %v1353_v60 = vpop.f32.mrb[24].mxu1 }
 0x458   :  { %v734_v63 = vpop.f32.mrb[25].mxu1 }
 0x459   :  { %v1354_v16 = vpop.f32.mrb[26].mxu1 }
 0x45a   :  { %v770_v17 = vpack.c.bf16 %v1354_v16, %v1353_v60  ;;  %v737_v18 = vpop.f32.mrb[27].mxu1 }
 0x45b   :  { %v769_v19 = vpack.c.bf16 %v737_v18, %v734_v63 }
 0x45d   :  { %1383 = vmatprep.mubr.bf16.mxu1 %v769_v19 }
 0x45e   :  { %1384 = vmatmul.mubr.bf16.vlgmr.msra.gmra.mrb[32].mxu1 %v770_v17 }
 0x45f   :  { %v1357_v20 = vpop.f32.mrb[28].mxu1 }
 0x460   :  { %v750_v21 = vpop.f32.mrb[29].mxu1 }
 0x461   :  { %v1358_v22 = vpop.f32.mrb[30].mxu1 }
 0x462   :  { %v772_v23 = vpack.c.bf16 %v1358_v22, %v1357_v20  ;;  %v753_v24 = vpop.f32.mrb[31].mxu1 }
 0x463   :  { %v771_v25 = vpack.c.bf16 %v753_v24, %v750_v21 }
 0x465   :  { %1387 = vmatprep.mubr.bf16.mxu1 %v771_v25 }
 0x466   :  { %1388 = vmatmul.mubr.bf16.gmra.mrb[36].mxu1 %v772_v23 }
 0x521   :  { %v1377_v28 = vpop.f32.mrb[32].mxu0 }
 0x522   :  { %v877_v31 = vpop.f32.mrb[33].mxu0  ;;  %v886_v33 = vadd.f32 %v1377_v28, %v794_v30 }
 0x523   :  { %v1378_v32 = vpop.f32.mrb[34].mxu0  ;;  %v878_v36 = vadd.f32 %v877_v31, %v794_v30 }
 0x524   :  { %v889_v34 = vadd.f32 %v1378_v32, %v794_v30  ;;  %v880_v35 = vpop.f32.mrb[35].mxu0 }
 0x525   :  { %v881_v37 = vadd.f32 %v880_v35, %v794_v30 }
 0x526   :  { %v1112_v38 = vpack.c.bf16 %v889_v34, %v886_v33 }
 0x527   :  { %v1107_v39 = vpack.c.bf16 %v881_v37, %v878_v36 }
 0x528   :  { %1144 = vst [vmem:[#allocation14 + $0x8] sm:$0xff] %v1112_v38  }
 0x529   :  { %1108 = vst [vmem:[#allocation14] sm:$0xff] %v1107_v39   ;;  %v1381_v40 = vpop.f32.mrb[36].mxu0 }
 0x52a   :  { %v893_v41 = vpop.f32.mrb[37].mxu0  ;;  %v902_v4 = vadd.f32 %v1381_v40, %v794_v30 }
 0x52b   :  { %v1382_v42 = vpop.f32.mrb[38].mxu0  ;;  %v894_v45 = vadd.f32 %v893_v41, %v794_v30 }
 0x52c   :  { %v905_v43 = vadd.f32 %v1382_v42, %v794_v30  ;;  %v896_v44 = vpop.f32.mrb[39].mxu0 }
 0x52d   :  { %v897_v27 = vadd.f32 %v896_v44, %v794_v30 }
 0x52e   :  { %v1122_v46 = vpack.c.bf16 %v905_v43, %v902_v4 }
 0x52f   :  { %v1117_v47 = vpack.c.bf16 %v897_v27, %v894_v45 }
 0x530   :  { %1146 = vst [vmem:[#allocation14 + $0x18] sm:$0xff] %v1122_v46  }
 0x531   :  { %1145 = vst [vmem:[#allocation14 + $0x10] sm:$0xff] %v1117_v47   ;;  %v1385_v48 = vpop.f32.mrb[32].mxu1 }
 0x532   :  { %v909_v49 = vpop.f32.mrb[33].mxu1  ;;  %v918_v51 = vadd.f32 %v1385_v48, %v794_v30 }
 0x533   :  { %v1386_v50 = vpop.f32.mrb[34].mxu1  ;;  %v910_v61 = vadd.f32 %v909_v49, %v794_v30 }
 0x534   :  { %v921_v52 = vadd.f32 %v1386_v50, %v794_v30  ;;  %v912_v53 = vpop.f32.mrb[35].mxu1 }
 0x535   :  { %v913_v62 = vadd.f32 %v912_v53, %v794_v30 }
 0x536   :  { %v1132_v0 = vpack.c.bf16 %v921_v52, %v918_v51 }
 0x537   :  { %v1127_v1 = vpack.c.bf16 %v913_v62, %v910_v61 }
 0x538   :  { %1148 = vst [vmem:[#allocation14 + $0x28] sm:$0xff] %v1132_v0  }
 0x539   :  { %1147 = vst [vmem:[#allocation14 + $0x20] sm:$0xff] %v1127_v1   ;;  %v1389_v2 = vpop.f32.mrb[36].mxu1 }
 0x53a   :  { %v925_v3 = vpop.f32.mrb[37].mxu1  ;;  %v934_v6 = vadd.f32 %v1389_v2, %v794_v30 }
 0x53b   :  { %v1390_v5 = vpop.f32.mrb[38].mxu1  ;;  %v926_v9 = vadd.f32 %v925_v3, %v794_v30 }
 0x53c   :  { %v937_v7 = vadd.f32 %v1390_v5, %v794_v30  ;;  %v928_v8 = vpop.f32.mrb[39].mxu1 }
 0x53d   :  { %v929_v10 = vadd.f32 %v928_v8, %v794_v30 }
 0x53e   :  { %v1142_v11 = vpack.c.bf16 %v937_v7, %v934_v6 }
 0x53f   :  { %v1137_v12 = vpack.c.bf16 %v929_v10, %v926_v9 }
 0x540   :  { %1150 = vst [vmem:[#allocation14 + $0x38] sm:$0xff] %v1142_v11  }
 0x541   :  { %1149 = vst [vmem:[#allocation14 + $0x30] sm:$0xff] %v1137_v12  }
 0x542   :  { %1614 = shalt.err (!%p1611_p4)
}
 0x543   :  { %s1615_s19 = scalar_lea.hbm %s1904_s7, 1024 }
 0x544   :  { %p1616_p5 = scmp.ne.s32.totalorder %s1904_s7, %s1615_s19  ;;  %p1619_p6 = scmp.lt.u32.totalorder %s1615_s19, %s1904_s7 }
 0x546   :  { %p1621_p7 = pnand %p1619_p6, %p1616_p5 }
 0x548   :  { %1624 = shalt.err (!%p1621_p7)
}
 0x549   :  { %1031 = dma.vmem_to_hbm [thread:$0]  %s1026_s30, 1024, %s1904_s7, [#allocation4], %s1637_s13, %s1637_s13, %s1638_s14  }
 0x54a   :  { %1633 = dma.done.wait [#allocation4], 1024  }
 0x54b   :  { %1634 = vsyncadd [#allocation4], 4294966272 }
 0x54c   :  { %1035 = vsyncpa [#allocation3], 1 }
 0x54d   :  { %1036 = vsyncpa [#allocation6], 1 }
 0x54e   :  { %1037 = vsyncpa [#allocation9], 1 }
 0x54f   :  { %1038 = vsyncpa [#allocation12], 1 }
 0x550   :  { %1039 = vsyncpa [#allocation4], 1 }

</bundles_post_ra>
